<compile_context>
chip_gen: v7x
topology: tpu7x:2x2x1
jax: 0.10.0
libtpu: 0.0.40
codegen_flags: <defaults>
</compile_context>

<pallas_src>
import jax
import jax.numpy as jnp
import numpy as np
from jax.experimental import pallas as pl
from jax.experimental.pallas import tpu as pltpu


def _round_up(x, m):
    return ((x + m - 1) // m) * m


def _choose_tm(M, Kp, Cp, out_itemsize, *, cap=512, vmem_budget=24 * 1024 * 1024):
    """Row-tile size: big enough to amortize per-step overhead, small enough to
    fit double-buffered tiles + resident weights inside the VMEM budget, and a
    multiple of 16 (bf16 out) / 8 (f32 out) sublanes."""
    mult = 16 if out_itemsize == 2 else 8
    # Resident (worst case double-buffered) weights/gamma/bias/beta.
    fixed = 2 * (Kp * Cp * 2 + Cp * Cp * 2 + 4 * Cp * 4)
    # Double-buffered patch tile (bf16) + output tile.
    per_row = 2 * Kp * 2 + 2 * Cp * out_itemsize
    tm_vmem = max(mult, ((vmem_budget - fixed) // per_row) // mult * mult)
    if M <= 16:
        tm = _round_up(M, mult)
    else:
        # >=2 grid steps when possible so ("parallel",) can use both v7x TCs.
        half = -(-M // 2)
        tm = max(16, min(cap, _round_up(half, 16)))
    return max(mult, min(tm, tm_vmem))


# ---------------------------------------------------------------------------
# Pallas kernel: fused (conv-as-matmul + bias) followed by GDN normalization.
# ---------------------------------------------------------------------------
def _conv_gdn_kernel(p_ref, w_ref, b_ref, gT_ref, beta_ref, o_ref):
    # conv: y = patches @ W + bias   (bf16 operands, f32 accumulation on the MXU)
    y = jnp.dot(p_ref[...], w_ref[...], preferred_element_type=jnp.float32)
    y = y + b_ref[...]
    # GDN: norm_i = beta_i + sum_j gamma_ij * y_j^2   (second small MXU matmul)
    x2 = (y * y).astype(jnp.bfloat16)
    norm = jnp.dot(x2, gT_ref[...], preferred_element_type=jnp.float32) + beta_ref[...]
    o_ref[...] = (y * jax.lax.rsqrt(norm)).astype(o_ref.dtype)


def conv5x5_gdn_layer(patches, wmat, bias, gammaT, beta, *, out_dtype=jnp.float32,
                      tm_cap=512):
    """patches: (M, Kp) bf16; wmat: (Kp, Cp) bf16; bias/beta: (1, Cp) f32;
    gammaT: (Cp, Cp) bf16.  Returns (M, Cp) in out_dtype."""
    M, Kp = patches.shape
    Kp2, Cp = wmat.shape
    assert Kp == Kp2
    out_itemsize = jnp.dtype(out_dtype).itemsize
    tm = _choose_tm(M, Kp, Cp, out_itemsize, cap=tm_cap)

    out = pl.pallas_call(
        _conv_gdn_kernel,
        out_shape=jax.ShapeDtypeStruct((M, Cp), out_dtype),
        grid_spec=pltpu.PrefetchScalarGridSpec(
            num_scalar_prefetch=0,
            grid=(pl.cdiv(M, tm),),          # ragged last tile handled by masking
            in_specs=[
                pl.BlockSpec((tm, Kp), lambda i: (i, 0)),    # patch tile (bf16)
                pl.BlockSpec((Kp, Cp), lambda i: (0, 0)),    # conv weight (resident, bf16)
                pl.BlockSpec((1, Cp), lambda i: (0, 0)),     # conv bias (f32)
                pl.BlockSpec((Cp, Cp), lambda i: (0, 0)),    # gamma^T (resident, bf16)
                pl.BlockSpec((1, Cp), lambda i: (0, 0)),     # beta (f32)
            ],
            out_specs=pl.BlockSpec((tm, Cp), lambda i: (i, 0)),   # lane-dense output
        ),
        compiler_params=pltpu.CompilerParams(
            dimension_semantics=("parallel",),
            vmem_limit_bytes=32 * 1024 * 1024,   # fits v7x (64 MiB) as well as v5e/v6e
        ),
    )(patches, wmat, bias, gammaT, beta)
    return out


# ---------------------------------------------------------------------------
# NHWC-native im2col for a 5x5 / stride-2 / pad-2 conv. Feature order (kh, kw, c).
# Emits bf16 (halves the HBM bytes of the expanded tensor) and fuses the zero
# padding of K up to `k_padded` into the same concatenate (single materialization).
# ---------------------------------------------------------------------------
def im2col_5x5_s2_nhwc(x, k_padded):
    N, H, W, C = x.shape
    k, s, p = 5, 2, 2
    Ho = (H + 2 * p - k) // s + 1
    Wo = (W + 2 * p - k) // s + 1
    xp = jnp.pad(x.astype(jnp.bfloat16), ((0, 0), (p, p), (p, p), (0, 0)))
    cols = [xp[:, ki:ki + s * Ho:s, kj:kj + s * Wo:s, :]
            for ki in range(k) for kj in range(k)]
    K = k * k * C
    if k_padded > K:
        cols.append(jnp.zeros((N, Ho, Wo, k_padded - K), jnp.bfloat16))
    patches = jnp.concatenate(cols, axis=-1).reshape(N * Ho * Wo, k_padded)
    return patches, Ho, Wo


# ---------------------------------------------------------------------------
# Parameter repacking (done once, outside the forward path).
# ---------------------------------------------------------------------------
def prepare_params(params):
    prepared = []
    for (w, b, gamma, beta) in params:
        Cout, Cin = int(w.shape[0]), int(w.shape[1])
        K = Cin * 25
        Kp = _round_up(K, 128)
        Cp = _round_up(Cout, 128)
        # row order (kh, kw, cin) to match the NHWC im2col column order
        wmat = jnp.transpose(w, (2, 3, 1, 0)).reshape(K, Cout)
        wmat = jnp.pad(wmat, ((0, Kp - K), (0, Cp - Cout))).astype(jnp.bfloat16)
        bias = jnp.pad(b, (0, Cp - Cout)).reshape(1, Cp).astype(jnp.float32)
        gT = jnp.pad(gamma.T, ((0, Cp - Cout), (0, Cp - Cout))).astype(jnp.bfloat16)
        # pad beta with 1.0 so padded channels stay finite (their y is 0 anyway)
        betap = jnp.pad(beta, (0, Cp - Cout), constant_values=1.0)
        betap = betap.reshape(1, Cp).astype(jnp.float32)
        prepared.append((wmat, bias, gT, betap, Cout))
    return prepared


# ---------------------------------------------------------------------------
# BaseEncoder5x5 forward (NCHW in, NCHW out). Activations stay NHWC (bf16)
# between layers; one transpose at entry and one at exit.
# ---------------------------------------------------------------------------
def base_encoder_5x5(x_nchw, prepared):
    x = jnp.transpose(x_nchw, (0, 2, 3, 1))  # NCHW -> NHWC, once
    N = x.shape[0]
    n_layers = len(prepared)
    for li, (wmat, bias, gT, beta, Cout) in enumerate(prepared):
        Kp = wmat.shape[0]
        patches, Ho, Wo = im2col_5x5_s2_nhwc(x, Kp)
        # Intermediate layers emit bf16 (next layer consumes bf16 anyway);
        # final layer emits f32 (module output dtype).
        out_dtype = jnp.float32 if li == n_layers - 1 else jnp.bfloat16
        out = conv5x5_gdn_layer(patches, wmat, bias, gT, beta, out_dtype=out_dtype)
        x = out[:, :Cout].reshape(N, Ho, Wo, Cout)
    return jnp.transpose(x, (0, 3, 1, 2))  # NHWC -> NCHW, once


# ---------------------------------------------------------------------------
# Deterministic init (conv ~ N(0, 1/fan_in); GDN: beta=1, gamma=0.1*I)
# ---------------------------------------------------------------------------
def init_params(key, channel):
    shapes = [(channel, 3), (channel, channel), (channel, channel)]
    params = []
    for i, (co, ci) in enumerate(shapes):
        kw, kb = jax.random.split(jax.random.fold_in(key, i))
        fan_in = ci * 25
        w = jax.random.normal(kw, (co, ci, 5, 5), jnp.float32) / np.sqrt(fan_in)
        b = 0.01 * jax.random.normal(kb, (co,), jnp.float32)
        gamma = 0.1 * jnp.eye(co, dtype=jnp.float32)
        beta = jnp.ones((co,), jnp.float32)
        params.append((w, b, gamma, beta))
    return params


# Pure-JAX reference (XLA convs). matmul_dtype=bf16 mimics the kernel's MXU operand
# precision (with f32 accumulation) for a tight structural check; f32 is the true
# module semantics.
def reference_encoder(x, params, *, matmul_dtype=jnp.float32):
    h = x
    for (w, b, gamma, beta) in params:
        h = jax.lax.conv_general_dilated(
            h.astype(matmul_dtype), w.astype(matmul_dtype), (2, 2), ((2, 2), (2, 2)),
            dimension_numbers=("NCHW", "OIHW", "NCHW"),
            preferred_element_type=jnp.float32)
        h = h + b[None, :, None, None]
        x2 = (h * h).astype(matmul_dtype)
        norm = jax.lax.conv_general_dilated(
            x2, gamma.astype(matmul_dtype)[:, :, None, None], (1, 1), "VALID",
            dimension_numbers=("NCHW", "OIHW", "NCHW"),
            preferred_element_type=jnp.float32)
        norm = norm + beta[None, :, None, None]
        h = h * jax.lax.rsqrt(norm)
    return h


if __name__ == "__main__":
    key = jax.random.PRNGKey(0)
    channel = 32
    kx, kp = jax.random.split(key)
    x = jax.random.normal(kx, (2, 3, 16, 16), jnp.float32)  # NCHW, like PyTorch
    params = init_params(kp, channel)
    prepared = prepare_params(params)

    fwd = jax.jit(lambda inp: base_encoder_5x5(inp, prepared))
    out = jax.block_until_ready(fwd(x))

    # shape check: 3x stride-2 downsamples of 16 -> 2
    assert out.shape == (2, channel, 2, 2), out.shape

    # Tight check vs. a reference with matched bf16 MXU operands / f32 accumulation.
    ref_bf16 = jax.block_until_ready(
        reference_encoder(x, params, matmul_dtype=jnp.bfloat16))
    np.testing.assert_allclose(np.asarray(out), np.asarray(ref_bf16),
                               rtol=1e-2, atol=1e-2)

    # Loose check vs. the pure-f32 module semantics (slack covers bf16 operand rounding
    # through three conv+GDN layers).
    ref_f32 = jax.block_until_ready(
        reference_encoder(x, params, matmul_dtype=jnp.float32))
    np.testing.assert_allclose(np.asarray(out), np.asarray(ref_f32),
                               rtol=5e-2, atol=5e-2)

    print("KERNEL_OK")
</pallas_src>

<mosaic_0001>
module attributes {stable_mosaic.version = 11 : i64} {
  func.func @_conv_gdn_kernel(%arg0: i32, %arg1: memref<64x128xbf16, #tpu.memory_space<vmem>>, %arg2: memref<128x128xbf16, #tpu.memory_space<vmem>>, %arg3: memref<1x128xf32, #tpu.memory_space<vmem>>, %arg4: memref<128x128xbf16, #tpu.memory_space<vmem>>, %arg5: memref<1x128xf32, #tpu.memory_space<vmem>>, %arg6: memref<64x128xbf16, #tpu.memory_space<vmem>>) attributes {dimension_semantics = [#tpu.dimension_semantics<parallel>], iteration_bounds = array<i64: 2>, scalar_prefetch = 0 : i64, scratch_operands = 0 : i64, tpu.core_type = #tpu.core_type<tc>, window_params = [{transform_indices = @transform_0, window_bounds = array<i64: 64, 128>}, {pipeline_mode = #tpu.pipeline_mode<synchronous>, transform_indices = @transform_1, window_bounds = array<i64: 128, 128>}, {pipeline_mode = #tpu.pipeline_mode<synchronous>, transform_indices = @transform_2, window_bounds = array<i64: 1, 128>}, {pipeline_mode = #tpu.pipeline_mode<synchronous>, transform_indices = @transform_3, window_bounds = array<i64: 128, 128>}, {pipeline_mode = #tpu.pipeline_mode<synchronous>, transform_indices = @transform_4, window_bounds = array<i64: 1, 128>}, {transform_indices = @transform_5, window_bounds = array<i64: 64, 128>}]} {
    %c0 = arith.constant 0 : index
    %c0_0 = arith.constant 0 : index
    %0 = vector.load %arg1[%c0, %c0_0] : memref<64x128xbf16, #tpu.memory_space<vmem>>, vector<64x128xbf16>
    %c0_1 = arith.constant 0 : index
    %c0_2 = arith.constant 0 : index
    %1 = vector.load %arg2[%c0_1, %c0_2] : memref<128x128xbf16, #tpu.memory_space<vmem>>, vector<128x128xbf16>
    %cst = arith.constant dense<0.000000e+00> : vector<64x128xf32>
    %2 = tpu.matmul %0, %1, %cst {dimension_numbers = #tpu.dot_dimension_numbers<[1], [0], [0], [1], [0, 0, 1, 1], [], []>} : vector<64x128xbf16>, vector<128x128xbf16>, vector<64x128xf32> -> vector<64x128xf32>
    %c0_3 = arith.constant 0 : index
    %c0_4 = arith.constant 0 : index
    %3 = vector.load %arg3[%c0_3, %c0_4] : memref<1x128xf32, #tpu.memory_space<vmem>>, vector<1x128xf32>
    %4 = vector.broadcast %3 : vector<1x128xf32> to vector<64x128xf32>
    %5 = arith.addf %2, %4 : vector<64x128xf32>
    %6 = arith.mulf %5, %5 : vector<64x128xf32>
    %7 = arith.truncf %6 : vector<64x128xf32> to vector<64x128xbf16>
    %c0_5 = arith.constant 0 : index
    %c0_6 = arith.constant 0 : index
    %8 = vector.load %arg4[%c0_5, %c0_6] : memref<128x128xbf16, #tpu.memory_space<vmem>>, vector<128x128xbf16>
    %cst_7 = arith.constant dense<0.000000e+00> : vector<64x128xf32>
    %9 = tpu.matmul %7, %8, %cst_7 {dimension_numbers = #tpu.dot_dimension_numbers<[1], [0], [0], [1], [0, 0, 1, 1], [], []>} : vector<64x128xbf16>, vector<128x128xbf16>, vector<64x128xf32> -> vector<64x128xf32>
    %c0_8 = arith.constant 0 : index
    %c0_9 = arith.constant 0 : index
    %10 = vector.load %arg5[%c0_8, %c0_9] : memref<1x128xf32, #tpu.memory_space<vmem>>, vector<1x128xf32>
    %11 = vector.broadcast %10 : vector<1x128xf32> to vector<64x128xf32>
    %12 = arith.addf %9, %11 : vector<64x128xf32>
    %13 = math.rsqrt %12 : vector<64x128xf32>
    %14 = arith.mulf %5, %13 : vector<64x128xf32>
    %15 = arith.truncf %14 : vector<64x128xf32> to vector<64x128xbf16>
    %c0_10 = arith.constant 0 : index
    %c0_11 = arith.constant 0 : index
    %16 = vector.load %arg6[%c0_10, %c0_11] : memref<64x128xbf16, #tpu.memory_space<vmem>>, vector<64x128xbf16>
    tpu.vector_store %arg6[%c0_10, %c0_11], %15 {strides = array<i32>} : memref<64x128xbf16, #tpu.memory_space<vmem>>, vector<64x128xbf16>,
    return
  }
  func.func @transform_0(%arg0: i32) -> (i32, i32) {
    %c0_i32 = arith.constant 0 : i32
    %c0_i32_0 = arith.constant 0 : i32
    return %arg0, %c0_i32 : i32, i32
  }
  func.func @transform_1(%arg0: i32) -> (i32, i32) {
    %c0_i32 = arith.constant 0 : i32
    %c0_i32_0 = arith.constant 0 : i32
    %c0_i32_1 = arith.constant 0 : i32
    return %c0_i32, %c0_i32_0 : i32, i32
  }
  func.func @transform_2(%arg0: i32) -> (i32, i32) {
    %c0_i32 = arith.constant 0 : i32
    %c0_i32_0 = arith.constant 0 : i32
    %c0_i32_1 = arith.constant 0 : i32
    return %c0_i32, %c0_i32_0 : i32, i32
  }
  func.func @transform_3(%arg0: i32) -> (i32, i32) {
    %c0_i32 = arith.constant 0 : i32
    %c0_i32_0 = arith.constant 0 : i32
    %c0_i32_1 = arith.constant 0 : i32
    return %c0_i32, %c0_i32_0 : i32, i32
  }
  func.func @transform_4(%arg0: i32) -> (i32, i32) {
    %c0_i32 = arith.constant 0 : i32
    %c0_i32_0 = arith.constant 0 : i32
    %c0_i32_1 = arith.constant 0 : i32
    return %c0_i32, %c0_i32_0 : i32, i32
  }
  func.func @transform_5(%arg0: i32) -> (i32, i32) {
    %c0_i32 = arith.constant 0 : i32
    %c0_i32_0 = arith.constant 0 : i32
    return %arg0, %c0_i32 : i32, i32
  }
}

module attributes {stable_mosaic.version = 11 : i64} {
  func.func @_conv_gdn_kernel(%arg0: i32, %arg1: memref<16x896xbf16, #tpu.memory_space<vmem>>, %arg2: memref<896x128xbf16, #tpu.memory_space<vmem>>, %arg3: memref<1x128xf32, #tpu.memory_space<vmem>>, %arg4: memref<128x128xbf16, #tpu.memory_space<vmem>>, %arg5: memref<1x128xf32, #tpu.memory_space<vmem>>, %arg6: memref<16x128xbf16, #tpu.memory_space<vmem>>) attributes {dimension_semantics = [#tpu.dimension_semantics<parallel>], iteration_bounds = array<i64: 2>, scalar_prefetch = 0 : i64, scratch_operands = 0 : i64, tpu.core_type = #tpu.core_type<tc>, window_params = [{transform_indices = @transform_0, window_bounds = array<i64: 16, 896>}, {pipeline_mode = #tpu.pipeline_mode<synchronous>, transform_indices = @transform_1, window_bounds = array<i64: 896, 128>}, {pipeline_mode = #tpu.pipeline_mode<synchronous>, transform_indices = @transform_2, window_bounds = array<i64: 1, 128>}, {pipeline_mode = #tpu.pipeline_mode<synchronous>, transform_indices = @transform_3, window_bounds = array<i64: 128, 128>}, {pipeline_mode = #tpu.pipeline_mode<synchronous>, transform_indices = @transform_4, window_bounds = array<i64: 1, 128>}, {transform_indices = @transform_5, window_bounds = array<i64: 16, 128>}]} {
    %c0 = arith.constant 0 : index
    %c0_0 = arith.constant 0 : index
    %0 = vector.load %arg1[%c0, %c0_0] : memref<16x896xbf16, #tpu.memory_space<vmem>>, vector<16x896xbf16>
    %c0_1 = arith.constant 0 : index
    %c0_2 = arith.constant 0 : index
    %1 = vector.load %arg2[%c0_1, %c0_2] : memref<896x128xbf16, #tpu.memory_space<vmem>>, vector<896x128xbf16>
    %cst = arith.constant dense<0.000000e+00> : vector<16x128xf32>
    %2 = tpu.matmul %0, %1, %cst {dimension_numbers = #tpu.dot_dimension_numbers<[1], [0], [0], [1], [0, 0, 1, 1], [], []>} : vector<16x896xbf16>, vector<896x128xbf16>, vector<16x128xf32> -> vector<16x128xf32>
    %c0_3 = arith.constant 0 : index
    %c0_4 = arith.constant 0 : index
    %3 = vector.load %arg3[%c0_3, %c0_4] : memref<1x128xf32, #tpu.memory_space<vmem>>, vector<1x128xf32>
    %4 = vector.broadcast %3 : vector<1x128xf32> to vector<16x128xf32>
    %5 = arith.addf %2, %4 : vector<16x128xf32>
    %6 = arith.mulf %5, %5 : vector<16x128xf32>
    %7 = arith.truncf %6 : vector<16x128xf32> to vector<16x128xbf16>
    %c0_5 = arith.constant 0 : index
    %c0_6 = arith.constant 0 : index
    %8 = vector.load %arg4[%c0_5, %c0_6] : memref<128x128xbf16, #tpu.memory_space<vmem>>, vector<128x128xbf16>
    %cst_7 = arith.constant dense<0.000000e+00> : vector<16x128xf32>
    %9 = tpu.matmul %7, %8, %cst_7 {dimension_numbers = #tpu.dot_dimension_numbers<[1], [0], [0], [1], [0, 0, 1, 1], [], []>} : vector<16x128xbf16>, vector<128x128xbf16>, vector<16x128xf32> -> vector<16x128xf32>
    %c0_8 = arith.constant 0 : index
    %c0_9 = arith.constant 0 : index
    %10 = vector.load %arg5[%c0_8, %c0_9] : memref<1x128xf32, #tpu.memory_space<vmem>>, vector<1x128xf32>
    %11 = vector.broadcast %10 : vector<1x128xf32> to vector<16x128xf32>
    %12 = arith.addf %9, %11 : vector<16x128xf32>
    %13 = math.rsqrt %12 : vector<16x128xf32>
    %14 = arith.mulf %5, %13 : vector<16x128xf32>
    %15 = arith.truncf %14 : vector<16x128xf32> to vector<16x128xbf16>
    %c0_10 = arith.constant 0 : index
    %c0_11 = arith.constant 0 : index
    %16 = vector.load %arg6[%c0_10, %c0_11] : memref<16x128xbf16, #tpu.memory_space<vmem>>, vector<16x128xbf16>
    tpu.vector_store %arg6[%c0_10, %c0_11], %15 {strides = array<i32>} : memref<16x128xbf16, #tpu.memory_space<vmem>>, vector<16x128xbf16>,
    return
  }
  func.func @transform_0(%arg0: i32) -> (i32, i32) {
    %c0_i32 = arith.constant 0 : i32
    %c0_i32_0 = arith.constant 0 : i32
    return %arg0, %c0_i32 : i32, i32
  }
  func.func @transform_1(%arg0: i32) -> (i32, i32) {
    %c0_i32 = arith.constant 0 : i32
    %c0_i32_0 = arith.constant 0 : i32
    %c0_i32_1 = arith.constant 0 : i32
    return %c0_i32, %c0_i32_0 : i32, i32
  }
  func.func @transform_2(%arg0: i32) -> (i32, i32) {
    %c0_i32 = arith.constant 0 : i32
    %c0_i32_0 = arith.constant 0 : i32
    %c0_i32_1 = arith.constant 0 : i32
    return %c0_i32, %c0_i32_0 : i32, i32
  }
  func.func @transform_3(%arg0: i32) -> (i32, i32) {
    %c0_i32 = arith.constant 0 : i32
    %c0_i32_0 = arith.constant 0 : i32
    %c0_i32_1 = arith.constant 0 : i32
    return %c0_i32, %c0_i32_0 : i32, i32
  }
  func.func @transform_4(%arg0: i32) -> (i32, i32) {
    %c0_i32 = arith.constant 0 : i32
    %c0_i32_0 = arith.constant 0 : i32
    %c0_i32_1 = arith.constant 0 : i32
    return %c0_i32, %c0_i32_0 : i32, i32
  }
  func.func @transform_5(%arg0: i32) -> (i32, i32) {
    %c0_i32 = arith.constant 0 : i32
    %c0_i32_0 = arith.constant 0 : i32
    return %arg0, %c0_i32 : i32, i32
  }
}

module attributes {stable_mosaic.version = 11 : i64} {
  func.func @_conv_gdn_kernel(%arg0: i32, %arg1: memref<8x896xbf16, #tpu.memory_space<vmem>>, %arg2: memref<896x128xbf16, #tpu.memory_space<vmem>>, %arg3: memref<1x128xf32, #tpu.memory_space<vmem>>, %arg4: memref<128x128xbf16, #tpu.memory_space<vmem>>, %arg5: memref<1x128xf32, #tpu.memory_space<vmem>>, %arg6: memref<8x128xf32, #tpu.memory_space<vmem>>) attributes {dimension_semantics = [#tpu.dimension_semantics<parallel>], iteration_bounds = array<i64: 1>, scalar_prefetch = 0 : i64, scratch_operands = 0 : i64, tpu.core_type = #tpu.core_type<tc>, window_params = [{transform_indices = @transform_0, window_bounds = array<i64: 8, 896>}, {pipeline_mode = #tpu.pipeline_mode<synchronous>, transform_indices = @transform_1, window_bounds = array<i64: 896, 128>}, {pipeline_mode = #tpu.pipeline_mode<synchronous>, transform_indices = @transform_2, window_bounds = array<i64: 1, 128>}, {pipeline_mode = #tpu.pipeline_mode<synchronous>, transform_indices = @transform_3, window_bounds = array<i64: 128, 128>}, {pipeline_mode = #tpu.pipeline_mode<synchronous>, transform_indices = @transform_4, window_bounds = array<i64: 1, 128>}, {transform_indices = @transform_5, window_bounds = array<i64: 8, 128>}]} {
    %c0 = arith.constant 0 : index
    %c0_0 = arith.constant 0 : index
    %0 = vector.load %arg1[%c0, %c0_0] : memref<8x896xbf16, #tpu.memory_space<vmem>>, vector<8x896xbf16>
    %c0_1 = arith.constant 0 : index
    %c0_2 = arith.constant 0 : index
    %1 = vector.load %arg2[%c0_1, %c0_2] : memref<896x128xbf16, #tpu.memory_space<vmem>>, vector<896x128xbf16>
    %cst = arith.constant dense<0.000000e+00> : vector<8x128xf32>
    %2 = tpu.matmul %0, %1, %cst {dimension_numbers = #tpu.dot_dimension_numbers<[1], [0], [0], [1], [0, 0, 1, 1], [], []>} : vector<8x896xbf16>, vector<896x128xbf16>, vector<8x128xf32> -> vector<8x128xf32>
    %c0_3 = arith.constant 0 : index
    %c0_4 = arith.constant 0 : index
    %3 = vector.load %arg3[%c0_3, %c0_4] : memref<1x128xf32, #tpu.memory_space<vmem>>, vector<1x128xf32>
    %4 = vector.broadcast %3 : vector<1x128xf32> to vector<8x128xf32>
    %5 = arith.addf %2, %4 : vector<8x128xf32>
    %6 = arith.mulf %5, %5 : vector<8x128xf32>
    %7 = arith.truncf %6 : vector<8x128xf32> to vector<8x128xbf16>
    %c0_5 = arith.constant 0 : index
    %c0_6 = arith.constant 0 : index
    %8 = vector.load %arg4[%c0_5, %c0_6] : memref<128x128xbf16, #tpu.memory_space<vmem>>, vector<128x128xbf16>
    %cst_7 = arith.constant dense<0.000000e+00> : vector<8x128xf32>
    %9 = tpu.matmul %7, %8, %cst_7 {dimension_numbers = #tpu.dot_dimension_numbers<[1], [0], [0], [1], [0, 0, 1, 1], [], []>} : vector<8x128xbf16>, vector<128x128xbf16>, vector<8x128xf32> -> vector<8x128xf32>
    %c0_8 = arith.constant 0 : index
    %c0_9 = arith.constant 0 : index
    %10 = vector.load %arg5[%c0_8, %c0_9] : memref<1x128xf32, #tpu.memory_space<vmem>>, vector<1x128xf32>
    %11 = vector.broadcast %10 : vector<1x128xf32> to vector<8x128xf32>
    %12 = arith.addf %9, %11 : vector<8x128xf32>
    %13 = math.rsqrt %12 : vector<8x128xf32>
    %14 = arith.mulf %5, %13 : vector<8x128xf32>
    %c0_10 = arith.constant 0 : index
    %c0_11 = arith.constant 0 : index
    %15 = vector.load %arg6[%c0_10, %c0_11] : memref<8x128xf32, #tpu.memory_space<vmem>>, vector<8x128xf32>
    tpu.vector_store %arg6[%c0_10, %c0_11], %14 {strides = array<i32>} : memref<8x128xf32, #tpu.memory_space<vmem>>, vector<8x128xf32>,
    return
  }
  func.func @transform_0(%arg0: i32) -> (i32, i32) {
    %c0_i32 = arith.constant 0 : i32
    %c0_i32_0 = arith.constant 0 : i32
    return %arg0, %c0_i32 : i32, i32
  }
  func.func @transform_1(%arg0: i32) -> (i32, i32) {
    %c0_i32 = arith.constant 0 : i32
    %c0_i32_0 = arith.constant 0 : i32
    %c0_i32_1 = arith.constant 0 : i32
    return %c0_i32, %c0_i32_0 : i32, i32
  }
  func.func @transform_2(%arg0: i32) -> (i32, i32) {
    %c0_i32 = arith.constant 0 : i32
    %c0_i32_0 = arith.constant 0 : i32
    %c0_i32_1 = arith.constant 0 : i32
    return %c0_i32, %c0_i32_0 : i32, i32
  }
  func.func @transform_3(%arg0: i32) -> (i32, i32) {
    %c0_i32 = arith.constant 0 : i32
    %c0_i32_0 = arith.constant 0 : i32
    %c0_i32_1 = arith.constant 0 : i32
    return %c0_i32, %c0_i32_0 : i32, i32
  }
  func.func @transform_4(%arg0: i32) -> (i32, i32) {
    %c0_i32 = arith.constant 0 : i32
    %c0_i32_0 = arith.constant 0 : i32
    %c0_i32_1 = arith.constant 0 : i32
    return %c0_i32, %c0_i32_0 : i32, i32
  }
  func.func @transform_5(%arg0: i32) -> (i32, i32) {
    %c0_i32 = arith.constant 0 : i32
    %c0_i32_0 = arith.constant 0 : i32
    return %arg0, %c0_i32 : i32, i32
  }
}

</mosaic_0001>

<bundles_post_ra>
// kernel: _lambda_.3
= control target key start
LH: loop header
LB: loop body
LE: loop exit
PB: predicated region body
PF: predicated region fallthrough
CT: control target
= control target key end

     0   :  { %s883_s18 = smov 0   ;;  %s967_s0 = inlined_call_operand.vmem [shape: bf16[128,128], index: 0, kind: input, shape index: {}]   ;;  %s968_s1 = inlined_call_operand.vmem [shape: bf16[128,128], index: 1, kind: input, shape index: {}]   ;;  %s969_s2 = inlined_call_operand.vmem [shape: f32[1,128], index: 2, kind: input, shape index: {}]   ;;  %s970_s3 = inlined_call_operand.vmem [shape: bf16[128,128], index: 3, kind: input, shape index: {}]   ;;  %s971_s4 = inlined_call_operand.vmem [shape: f32[1,128], index: 4, kind: input, shape index: {}]   ;;  %s972_s5 = inlined_call_operand.vmem [shape: bf16[128,128], index: 5, kind: output, shape index: {}]  }
   0x1 LB: > { %s657_s19 = sadd.s32 4294967295, %s851_s18   ;;  %p661_p0 = scmp.ge.s32.totalorder %s851_s18, 1  ;;  %s851_s18 = sphi %s883_s18, %s15_s18  }
   0x2   : > { %p188_p1 = scmp.lt.s32.totalorder %s851_s18, 3 }
   0x4   : > { %p189_p2 = pnand %p661_p0, %p188_p1 }
   0x5   : > { %v809_v0 = vld [vmem:[%s968_s1] sm:$0xff] (!%p189_p2)   ;;  %s662_s22 = sshll.u32 (!%p189_p2), %s657_s19, 3  ;;  %v810_v1 = vld [vmem:[%s968_s1 + $0x8] sm:$0xff] (!%p189_p2)   ;;  %v811_v2 = vld [vmem:[%s968_s1 + $0x10] sm:$0xff] (!%p189_p2)  }
   0x6   : > { %192 = sbr.rel (%p189_p2) target bundleno = 501 (0x1f5), region = 40  ;;  %p217_p3 = scmp.lt.s32.totalorder (!%p189_p2), %s662_s22, 15  ;;  %753 = vmatprep.subr.bf16.mxu0 (!%p189_p2), %v809_v0  ;;  %v812_v3 = vld [vmem:[%s968_s1 + $0x18] sm:$0xff] (!%p189_p2)   ;;  %v813_v5 = vld [vmem:[%s968_s1 + $0x20] sm:$0xff] (!%p189_p2)   ;;  %v822_v7 = vld [vmem:[%s970_s3 + $0x8] sm:$0xff] (!%p189_p2)  }
   0x7   : > { %754 = vmatpush3.bf16.msra.mxu0 (!%p189_p2), %v809_v0  ;;  %v821_v6 = vld [vmem:[%s970_s3] sm:$0xff] (!%p189_p2)   ;;  %v814_v8 = vld [vmem:[%s968_s1 + $0x28] sm:$0xff] (!%p189_p2)   ;;  %v823_v9 = vld [vmem:[%s970_s3 + $0x10] sm:$0xff] (!%p189_p2)  }
   0x8   : > { %755 = vmatprep.subr.bf16.mxu0 (!%p189_p2), %v810_v1  ;;  %777 = vmatprep.subr.bf16.mxu1 (!%p189_p2), %v821_v6  ;;  %v815_v10 = vld [vmem:[%s968_s1 + $0x30] sm:$0xff] (!%p189_p2)   ;;  %v824_v11 = vld [vmem:[%s970_s3 + $0x18] sm:$0xff] (!%p189_p2)   ;;  %v825_v13 = vld [vmem:[%s970_s3 + $0x20] sm:$0xff] (!%p189_p2)  }
   0x9   : > { %778 = vmatpush3.bf16.msra.mxu1 (!%p189_p2), %v821_v6  ;;  %v816_v12 = vld [vmem:[%s968_s1 + $0x38] sm:$0xff] (!%p189_p2)   ;;  %v826_v14 = vld [vmem:[%s970_s3 + $0x28] sm:$0xff] (!%p189_p2)   ;;  %v827_v18 = vld [vmem:[%s970_s3 + $0x30] sm:$0xff] (!%p189_p2)  }
   0xa   : > { %779 = vmatprep.subr.bf16.mxu1 (!%p189_p2), %v822_v7  ;;  %v828_v19 = vld [vmem:[%s970_s3 + $0x38] sm:$0xff] (!%p189_p2)   ;;  %v666_v20 = vld [vmem:[%s969_s2] ss:$0 sm:$0xff] (!%p189_p2) }
   0xb   : > { %756 = vmatpush3.bf16.msra.mxu0 (!%p189_p2), %v810_v1  ;;  %v679_v49 = vld [vmem:[%s971_s4] ss:$0 sm:$0xff] (!%p189_p2) }
   0xc   : > { %757 = vmatprep.subr.bf16.mxu0 (!%p189_p2), %v811_v2 }
   0xd   : > { %s974_s22 = smov (!%p217_p3, %s662_s22), 15  ;;  %780 = vmatpush3.bf16.msra.mxu1 %v822_v7 }
   0xe   : > { %s663_s27 = sshll.u32 %s974_s22, 2  ;;  %781 = vmatprep.subr.bf16.mxu1 %v823_v9 }
   0xf   : > { %s908_s30 = scalar_lea.vmem %s967_s0, %s663_s27  ;;  %758 = vmatpush3.bf16.msra.mxu0 %v811_v2  ;;  %s226_s16 = scalar_lea.vmem %s972_s5, %s663_s27 }
  0x10   : > { %v817_v4 = vld [vmem:[%s908_s30] sm:$0xff]   ;;  %759 = vmatprep.subr.bf16.mxu0 %v812_v3  ;;  %v818_v15 = vld [vmem:[%s908_s30 + $0x8] sm:$0xff]   ;;  %v819_v16 = vld [vmem:[%s908_s30 + $0x10] sm:$0xff]  }
  0x11   : > { %769 = vmatprep.mubr.bf16.mxu0 %v817_v4  ;;  %782 = vmatpush3.bf16.msra.mxu1 %v823_v9  ;;  %v820_v17 = vld [vmem:[%s908_s30 + $0x18] sm:$0xff]  }
  0x12   : > { %783 = vmatprep.subr.bf16.mxu1 %v824_v11 }
  0x13   : > { %760 = vmatpush3.bf16.msra.mxu0 %v812_v3 }
  0x14   : > { %761 = vmatprep.subr.bf16.mxu0 %v813_v5 }
  0x15   : > { %784 = vmatpush3.bf16.msra.mxu1 %v824_v11 }
  0x16   : > { %785 = vmatprep.subr.bf16.mxu1 %v825_v13 }
  0x17   : > { %762 = vmatpush3.bf16.msra.mxu0 %v813_v5 }
  0x18   : > { %763 = vmatprep.subr.bf16.mxu0 %v814_v8 }
  0x19   : > { %786 = vmatpush3.bf16.msra.mxu1 %v825_v13 }
  0x1a   : > { %787 = vmatprep.subr.bf16.mxu1 %v826_v14 }
  0x1b   : > { %764 = vmatpush3.bf16.msra.mxu0 %v814_v8 }
  0x1c   : > { %765 = vmatprep.subr.bf16.mxu0 %v815_v10 }
  0x1d   : > { %788 = vmatpush3.bf16.msra.mxu1 %v826_v14 }
  0x1e   : > { %789 = vmatprep.subr.bf16.mxu1 %v827_v18 }
  0x1f   : > { %766 = vmatpush3.bf16.msra.mxu0 %v815_v10 }
  0x20   : > { %767 = vmatprep.subr.bf16.mxu0 %v816_v12 }
  0x21   : > { %790 = vmatpush3.bf16.msra.mxu1 %v827_v18 }
  0x22   : > { %791 = vmatprep.subr.bf16.mxu1 %v828_v19 }
  0x23   : > { %768 = vmatpush3.bf16.msra.mxu0 %v816_v12 }
  0x25   : > { %792 = vmatpush3.bf16.msra.mxu1 %v828_v19 }
  0x26   : > { %770 = vmatmul.mubr.bf16.vlgmr.msra.gmra.mrb[0].mxu0 %v818_v15 }
  0x27   : > { %773 = vmatprep.mubr.bf16.mxu0 %v819_v16 }
  0x2e   : > { %774 = vmatmul.mubr.bf16.gmra.mrb[4].mxu0 %v820_v17 }
  0xf9   : > { %v771_v21 = vpop.f32.mrb[0].mxu0 }
  0xfa   : > { %v366_v22 = vpop.f32.mrb[1].mxu0  ;;  %v375_v25 = vadd.f32 %v771_v21, %v666_v20 }
  0xfb   : > { %v367_v23 = vadd.f32 %v666_v20, %v366_v22  ;;  %v772_v24 = vpop.f32.mrb[2].mxu0 }
  0xfc   : > { %v378_v26 = vadd.f32 %v772_v24, %v666_v20  ;;  %v369_v27 = vpop.f32.mrb[3].mxu0  ;;  %v399_v32 = vmul.f32 %v375_v25, %v375_v25 }
  0xfd   : > { %v370_v28 = vadd.f32 %v666_v20, %v369_v27  ;;  %v397_v30 = vmul.f32 %v367_v23, %v367_v23 }
  0xfe   : > { %v400_v29 = vmul.f32 %v378_v26, %v378_v26 }
  0xff   : > { %v398_v31 = vmul.f32 %v370_v28, %v370_v28 }
 0x100   : > { %v406_v36 = vpack.c.bf16 %v400_v29, %v399_v32 }
 0x101   : > { %v775_v33 = vpop.f32.mrb[4].mxu0  ;;  %v405_v34 = vpack.c.bf16 %v398_v31, %v397_v30 }
 0x102   : > { %v382_v35 = vpop.f32.mrb[5].mxu0  ;;  %v391_v39 = vadd.f32 %v775_v33, %v666_v20 }
 0x103   : > { %v383_v37 = vadd.f32 %v666_v20, %v382_v35  ;;  %v776_v38 = vpop.f32.mrb[6].mxu0  ;;  %793 = vmatprep.mubr.bf16.mxu1 %v405_v34 }
 0x104   : > { %v394_v40 = vadd.f32 %v776_v38, %v666_v20  ;;  %v385_v41 = vpop.f32.mrb[7].mxu0  ;;  %794 = vmatmul.mubr.bf16.vlgmr.msra.gmra.mrb[0].mxu1 %v406_v36  ;;  %v403_v46 = vmul.f32 %v391_v39, %v391_v39 }
 0x105   : > { %v386_v42 = vadd.f32 %v666_v20, %v385_v41  ;;  %v401_v44 = vmul.f32 %v383_v37, %v383_v37 }
 0x106   : > { %v404_v43 = vmul.f32 %v394_v40, %v394_v40 }
 0x107   : > { %v402_v45 = vmul.f32 %v386_v42, %v386_v42 }
 0x108   : > { %v408_v48 = vpack.c.bf16 %v404_v43, %v403_v46 }
 0x109   : > { %v407_v47 = vpack.c.bf16 %v402_v45, %v401_v44 }
 0x10b   : > { %797 = vmatprep.mubr.bf16.mxu1 %v407_v47 }
 0x10c   : > { %798 = vmatmul.mubr.bf16.gmra.mrb[4].mxu1 %v408_v48 }
 0x1d7   : > { %v795_v50 = vpop.f32.mrb[0].mxu1 }
 0x1d8   : > { %v523_v51 = vadd.f32 %v795_v50, %v679_v49  ;;  %v514_v52 = vpop.f32.mrb[1].mxu1 }
 0x1d9   : > { %v515_v53 = vadd.f32 %v679_v49, %v514_v52  ;;  %v796_v54 = vpop.f32.mrb[2].mxu1 }
 0x1da   : > { %829 = vrsqrt.f32 %v523_v51  ;;  %v526_v55 = vadd.f32 %v796_v54, %v679_v49  ;;  %v517_v56 = vpop.f32.mrb[3].mxu1 }
 0x1db   : > { %831 = vrsqrt.f32 %v515_v53  ;;  %v518_v57 = vadd.f32 %v679_v49, %v517_v56 }
 0x1dc   : > { %833 = vrsqrt.f32 %v526_v55 }
 0x1dd   : > { %835 = vrsqrt.f32 %v518_v57 }
 0x1df   : > { %v799_v58 = vpop.f32.mrb[4].mxu1 }
 0x1e0   : > { %v539_v59 = vadd.f32 %v799_v58, %v679_v49  ;;  %v530_v60 = vpop.f32.mrb[5].mxu1 }
 0x1e1   : > { %v531_v61 = vadd.f32 %v679_v49, %v530_v60  ;;  %v800_v62 = vpop.f32.mrb[6].mxu1 }
 0x1e2   : > { %837 = vrsqrt.f32 %v539_v59  ;;  %v542_v63 = vadd.f32 %v800_v62, %v679_v49  ;;  %v533_v0 = vpop.f32.mrb[7].mxu1 }
 0x1e3   : > { %839 = vrsqrt.f32 %v531_v61  ;;  %v534_v1 = vadd.f32 %v679_v49, %v533_v0 }
 0x1e4   : > { %v830_v2 = vpop.eup %829  ;;  %841 = vrsqrt.f32 %v542_v63 }
 0x1e5   : > { %v832_v3 = vpop.eup %831  ;;  %843 = vrsqrt.f32 %v534_v1  ;;  %v555_v6 = vmul.f32 %v830_v2, %v375_v25 }
 0x1e6   : > { %v834_v4 = vpop.eup %833  ;;  %v553_v8 = vmul.f32 %v832_v3, %v367_v23 }
 0x1e7   : > { %v836_v5 = vpop.eup %835  ;;  %v556_v7 = vmul.f32 %v834_v4, %v378_v26 }
 0x1e8   : > { %v554_v9 = vmul.f32 %v836_v5, %v370_v28 }
 0x1e9   : > { %v714_v10 = vpack.c.bf16 %v556_v7, %v555_v6 }
 0x1ea   : > { %v709_v11 = vpack.c.bf16 %v554_v9, %v553_v8 }
 0x1eb   : > { %726 = vst [vmem:[%s226_s16 + $0x8] sm:$0xff] %v714_v10  }
 0x1ec   : > { %v838_v12 = vpop.eup %837  ;;  %710 = vst [vmem:[%s226_s16] sm:$0xff] %v709_v11  }
 0x1ed   : > { %v840_v13 = vpop.eup %839  ;;  %v559_v16 = vmul.f32 %v838_v12, %v391_v39 }
 0x1ee   : > { %v842_v14 = vpop.eup %841  ;;  %v557_v18 = vmul.f32 %v840_v13, %v383_v37 }
 0x1ef   : > { %v844_v15 = vpop.eup %843  ;;  %v560_v17 = vmul.f32 %v842_v14, %v394_v40 }
 0x1f0   : > { %v558_v19 = vmul.f32 %v844_v15, %v386_v42 }
 0x1f1   : > { %v724_v20 = vpack.c.bf16 %v560_v17, %v559_v16 }
 0x1f2   : > { %v719_v21 = vpack.c.bf16 %v558_v19, %v557_v18 }
 0x1f3   : > { %728 = vst [vmem:[%s226_s16 + $0x18] sm:$0xff] %v724_v20  }
 0x1f4   : > { %727 = vst [vmem:[%s226_s16 + $0x10] sm:$0xff] %v719_v21  }
 0x1f5 PF: > { %s15_s18 = sadd.s32 1, %s851_s18  }
 0x1f6   : > { %p12_p4 = scmp.ge.s32.totalorder %s15_s18, 4  }
 0x1f8   :  { %14 = sbr.rel (!%p12_p4) target bundleno = 1 (0x1), region = 70 }

// kernel: _lambda_.4
= control target key start
LH: loop header
LB: loop body
LE: loop exit
PB: predicated region body
PF: predicated region fallthrough
CT: control target
= control target key end

     0   :  { %s1426_s18 = smov 0   ;;  %s1676_s0 = inlined_call_operand.vmem [shape: bf16[32,896], index: 0, kind: input, shape index: {}]   ;;  %s1677_s1 = inlined_call_operand.vmem [shape: bf16[896,128], index: 1, kind: input, shape index: {}]   ;;  %s1678_s2 = inlined_call_operand.vmem [shape: f32[1,128], index: 2, kind: input, shape index: {}]   ;;  %s1679_s3 = inlined_call_operand.vmem [shape: bf16[128,128], index: 3, kind: input, shape index: {}]   ;;  %s1680_s4 = inlined_call_operand.vmem [shape: f32[1,128], index: 4, kind: input, shape index: {}]   ;;  %s1681_s5 = inlined_call_operand.vmem [shape: bf16[32,128], index: 5, kind: output, shape index: {}]  }
   0x1 LB: > { %s1080_s19 = sadd.s32 4294967295, %s1392_s18   ;;  %p1084_p0 = scmp.ge.s32.totalorder %s1392_s18, 1  ;;  %s1392_s18 = sphi %s1426_s18, %s15_s18  }
   0x2   : > { %p189_p1 = scmp.lt.s32.totalorder %s1392_s18, 3 }
   0x4   : > { %p190_p2 = pnand %p1084_p0, %p189_p1 }
   0x5   : > { %v1308_v0 = vld [vmem:[%s1677_s1 + $0x40] sm:$0xff] (!%p190_p2)   ;;  %v1312_v4 = vld [vmem:[%s1677_s1 + $0x48] sm:$0xff] (!%p190_p2)   ;;  %v1316_v8 = vld [vmem:[%s1677_s1 + $0x50] sm:$0xff] (!%p190_p2)   ;;  %s1085_s25 = sshll.u32 (!%p190_p2), %s1080_s19, 1  ;;  %v1394_v38 = vmov (!%p190_p2), 0.0   ;;  %vm1395_vm0 = vmmov (!%p190_p2), 0  }
   0x6   : > { %193 = sbr.rel (%p190_p2) target bundleno = 527 (0x20f), region = 40  ;;  %v1309_v1 = vld [vmem:[%s1677_s1] sm:$0xff] (!%p190_p2)   ;;  %1173 = vmatprep.subr.bf16.mxu0 (!%p190_p2), %v1308_v0  ;;  %v1313_v5 = vld [vmem:[%s1677_s1 + $0x8] sm:$0xff] (!%p190_p2)   ;;  %v1317_v9 = vld [vmem:[%s1677_s1 + $0x10] sm:$0xff] (!%p190_p2)   ;;  %p219_p3 = scmp.lt.s32.totalorder (!%p190_p2), %s1085_s25, 3 }
   0x7   : > { %v1310_v2 = vld [vmem:[%s1677_s1 + $0xc0] sm:$0xff] (!%p190_p2)   ;;  %1174 = vmatpush3.bf16.msra.mxu0 (!%p190_p2), %v1309_v1  ;;  %v1314_v6 = vld [vmem:[%s1677_s1 + $0xc8] sm:$0xff] (!%p190_p2)   ;;  %v1318_v10 = vld [vmem:[%s1677_s1 + $0xd0] sm:$0xff] (!%p190_p2)  }
   0x8   : > { %v1311_v3 = vld [vmem:[%s1677_s1 + $0x80] sm:$0xff] (!%p190_p2)   ;;  %1195 = vmatprep.subr.bf16.mxu1 (!%p190_p2), %v1310_v2  ;;  %1175 = vmatprep.subr.bf16.mxu0 (!%p190_p2), %v1312_v4  ;;  %v1315_v7 = vld [vmem:[%s1677_s1 + $0x88] sm:$0xff] (!%p190_p2)   ;;  %v1319_v11 = vld [vmem:[%s1677_s1 + $0x90] sm:$0xff] (!%p190_p2)  }
   0x9   : > { %1196 = vmatpush3.bf16.msra.mxu1 (!%p190_p2), %v1311_v3  ;;  %v1320_v12 = vld [vmem:[%s1677_s1 + $0x58] sm:$0xff] (!%p190_p2)   ;;  %v1324_v16 = vld [vmem:[%s1677_s1 + $0x60] sm:$0xff] (!%p190_p2)   ;;  %v1328_v20 = vld [vmem:[%s1677_s1 + $0x68] sm:$0xff] (!%p190_p2)  }
   0xa   : > { %1197 = vmatprep.subr.bf16.mxu1 (!%p190_p2), %v1314_v6  ;;  %v1321_v13 = vld [vmem:[%s1677_s1 + $0x18] sm:$0xff] (!%p190_p2)   ;;  %v1325_v17 = vld [vmem:[%s1677_s1 + $0x20] sm:$0xff] (!%p190_p2)   ;;  %v1329_v21 = vld [vmem:[%s1677_s1 + $0x28] sm:$0xff] (!%p190_p2)  }
   0xb   : > { %1176 = vmatpush3.bf16.msra.mxu0 (!%p190_p2), %v1313_v5  ;;  %v1322_v14 = vld [vmem:[%s1677_s1 + $0xd8] sm:$0xff] (!%p190_p2)   ;;  %v1326_v18 = vld [vmem:[%s1677_s1 + $0xe0] sm:$0xff] (!%p190_p2)   ;;  %v1330_v22 = vld [vmem:[%s1677_s1 + $0xe8] sm:$0xff] (!%p190_p2)  }
   0xc   : > { %1177 = vmatprep.subr.bf16.mxu0 (!%p190_p2), %v1316_v8  ;;  %v1323_v15 = vld [vmem:[%s1677_s1 + $0x98] sm:$0xff] (!%p190_p2)   ;;  %v1327_v19 = vld [vmem:[%s1677_s1 + $0xa0] sm:$0xff] (!%p190_p2)   ;;  %v1331_v23 = vld [vmem:[%s1677_s1 + $0xa8] sm:$0xff] (!%p190_p2)  }
   0xd   : > { %1198 = vmatpush3.bf16.msra.mxu1 %v1315_v7  ;;  %s1683_s25 = smov (!%p219_p3, %s1085_s25), 3  ;;  %v1332_v24 = vld [vmem:[%s1677_s1 + $0x70] sm:$0xff]   ;;  %v1336_v28 = vld [vmem:[%s1677_s1 + $0x78] sm:$0xff]   ;;  %v1343_v34 = vld [vmem:[%s1677_s1 + $0x140] sm:$0xff]  }
   0xe   : > { %1199 = vmatprep.subr.bf16.mxu1 %v1318_v10  ;;  %s1297_s24 = smul.u32 28, %s1683_s25  ;;  %v1333_v25 = vld [vmem:[%s1677_s1 + $0x30] sm:$0xff]   ;;  %v1337_v29 = vld [vmem:[%s1677_s1 + $0x38] sm:$0xff]   ;;  %v1347_v37 = vld [vmem:[%s1677_s1 + $0x100] sm:$0xff]   ;;  %s1088_s20 = sshll.u32 %s1683_s25, 2 }
   0xf   : > { %1178 = vmatpush3.bf16.msra.mxu0 %v1317_v9  ;;  %v1334_v26 = vld [vmem:[%s1677_s1 + $0xf0] sm:$0xff]   ;;  %v1338_v30 = vld [vmem:[%s1677_s1 + $0xf8] sm:$0xff]   ;;  %v1348_v39 = vld [vmem:[%s1677_s1 + $0x180] sm:$0xff]   ;;  %s229_s23 = scalar_lea.vmem %s1681_s5, %s1088_s20 }
  0x10   : > { %1179 = vmatprep.subr.bf16.mxu0 %v1320_v12  ;;  %v1335_v27 = vld [vmem:[%s1677_s1 + $0xb0] sm:$0xff]   ;;  %s1529_s10 = scalar_lea.vmem %s1676_s0, %s1297_s24  ;;  %v1342_v33 = vld [vmem:[%s1677_s1 + $0xb8] sm:$0xff]   ;;  %v1349_v40 = vld [vmem:[%s1677_s1 + $0x148] sm:$0xff]  }
  0x11   : > { %1200 = vmatpush3.bf16.msra.mxu1 %v1319_v11  ;;  %v1339_v31 = vld [vmem:[%s1529_s10] ss:$28 sps:$4 sm:$0xff]   ;;  %v1344_v35 = vld [vmem:[%s1529_s10 + $0x8] ss:$28 sps:$4 sm:$0xff]   ;;  %v1352_v43 = vld [vmem:[%s1677_s1 + $0x150] sm:$0xff]  }
  0x12   : > { %1201 = vmatprep.subr.bf16.mxu1 %v1322_v14  ;;  %v1341_v32 = vld [vmem:[%s1529_s10 + $0x4] ss:$28 sps:$4 sm:$0xff]   ;;  %v1346_v36 = vld [vmem:[%s1529_s10 + $0xc] ss:$28 sps:$4 sm:$0xff]   ;;  %v1353_v44 = vld [vmem:[%s1677_s1 + $0x110] sm:$0xff]  }
  0x13   : > { %1180 = vmatpush3.bf16.msra.mxu0 %v1321_v13  ;;  %763 = vmatprep.mubr.bf16.mxu0 %v1341_v32  ;;  %v1350_v41 = vld [vmem:[%s1677_s1 + $0x108] sm:$0xff]   ;;  %v1354_v45 = vld [vmem:[%s1677_s1 + $0x190] sm:$0xff]   ;;  %v1355_v46 = vld [vmem:[%s1677_s1 + $0x158] sm:$0xff]  }
  0x14   : > { %1181 = vmatprep.subr.bf16.mxu0 %v1324_v16  ;;  %804 = vmatprep.mubr.bf16.mxu1 %v1346_v36  ;;  %v1351_v42 = vld [vmem:[%s1677_s1 + $0x188] sm:$0xff]   ;;  %v1356_v47 = vld [vmem:[%s1677_s1 + $0x118] sm:$0xff]   ;;  %v1358_v49 = vld [vmem:[%s1677_s1 + $0x160] sm:$0xff]  }
  0x15   : > { %1202 = vmatpush3.bf16.msra.mxu1 %v1323_v15  ;;  %v1357_v48 = vld [vmem:[%s1677_s1 + $0x198] sm:$0xff]   ;;  %v1359_v50 = vld [vmem:[%s1677_s1 + $0x120] sm:$0xff]   ;;  %v1361_v52 = vld [vmem:[%s1677_s1 + $0x168] sm:$0xff]  }
  0x16   : > { %1203 = vmatprep.subr.bf16.mxu1 %v1326_v18  ;;  %v1360_v51 = vld [vmem:[%s1677_s1 + $0x1a0] sm:$0xff]   ;;  %v1362_v53 = vld [vmem:[%s1677_s1 + $0x128] sm:$0xff]   ;;  %v1364_v55 = vld [vmem:[%s1677_s1 + $0x170] sm:$0xff]  }
  0x17   : > { %1182 = vmatpush3.bf16.msra.mxu0 %v1325_v17  ;;  %v1363_v54 = vld [vmem:[%s1677_s1 + $0x1a8] sm:$0xff]   ;;  %v1365_v56 = vld [vmem:[%s1677_s1 + $0x130] sm:$0xff]   ;;  %v1367_v59 = vld [vmem:[%s1677_s1 + $0x178] sm:$0xff]  }
  0x18   : > { %1183 = vmatprep.subr.bf16.mxu0 %v1328_v20  ;;  %v1366_v57 = vld [vmem:[%s1677_s1 + $0x1b0] sm:$0xff]   ;;  %v1368_v60 = vld [vmem:[%s1677_s1 + $0x138] sm:$0xff]   ;;  %v1374_v0 = vld [vmem:[%s1679_s3] sm:$0xff]  }
  0x19   : > { %1204 = vmatpush3.bf16.msra.mxu1 %v1327_v19  ;;  %v1371_v58 = vld [vmem:[%s1529_s10 + $0x14] ss:$28 sps:$4 sm:$0xff]   ;;  %v1372_v61 = vld [vmem:[%s1677_s1 + $0x1b8] sm:$0xff]   ;;  %v1375_v1 = vld [vmem:[%s1679_s3 + $0x8] sm:$0xff]  }
  0x1a   : > { %1205 = vmatprep.subr.bf16.mxu1 %v1330_v22  ;;  %v1369_v62 = vld [vmem:[%s1529_s10 + $0x10] ss:$28 sps:$4 sm:$0xff]   ;;  %v1373_v63 = vld [vmem:[%s1529_s10 + $0x18] ss:$28 sps:$4 sm:$0xff]   ;;  %v1378_v4 = vld [vmem:[%s1679_s3 + $0x20] sm:$0xff]  }
  0x1b   : > { %1184 = vmatpush3.bf16.msra.mxu0 %v1329_v21  ;;  %v1376_v2 = vld [vmem:[%s1679_s3 + $0x10] sm:$0xff]   ;;  %v1377_v3 = vld [vmem:[%s1679_s3 + $0x18] sm:$0xff]   ;;  %v1379_v5 = vld [vmem:[%s1679_s3 + $0x28] sm:$0xff]  }
  0x1c   : > { %1185 = vmatprep.subr.bf16.mxu0 %v1332_v24  ;;  %v1380_v6 = vld [vmem:[%s1679_s3 + $0x30] sm:$0xff]   ;;  %v1381_v7 = vld [vmem:[%s1679_s3 + $0x38] sm:$0xff]   ;;  %v1089_v9 = vld [vmem:[%s1678_s2] ss:$0 sm:$0xff] }
  0x1d   : > { %1206 = vmatpush3.bf16.msra.mxu1 %v1331_v23 }
  0x1e   : > { %1207 = vmatprep.subr.bf16.mxu1 %v1334_v26 }
  0x1f   : > { %1186 = vmatpush3.bf16.msra.mxu0 %v1333_v25 }
  0x20   : > { %1187 = vmatprep.subr.bf16.mxu0 %v1336_v28 }
  0x21   : > { %1208 = vmatpush3.bf16.msra.mxu1 %v1335_v27 }
  0x22   : > { %1209 = vmatprep.subr.bf16.mxu1 %v1338_v30 }
  0x23   : > { %1188 = vmatpush3.bf16.msra.mxu0 %v1337_v29 }
  0x24   : > { %1217 = vmatprep.subr.bf16.mxu0 %v1343_v34 }
  0x25   : > { %1210 = vmatpush3.bf16.msra.mxu1 %v1342_v33 }
  0x26   : > { %764 = vmatmul.mubr.bf16.vlgmr.msra.gmra.mrb[0].mxu0 %v1339_v31  ;;  %1257 = vmatprep.subr.bf16.mxu1 %v1394_v38 }
  0x27   : > { %1218 = vmatpush3.bf16.msra.mxu0 %v1347_v37  ;;  %845 = vmatprep.mubr.bf16.mxu0 %v1371_v58 }
  0x28   : > { %805 = vmatmul.mubr.bf16.vlgmr.msra.gmra.mrb[0].mxu1 %v1344_v35  ;;  %1219 = vmatprep.subr.bf16.mxu0 %v1349_v40 }
  0x29   : > { %1258 = vmatpush3.bf16.msra.mxu1 %v1348_v39  ;;  %1273 = vmatprep.mubr.msk.bf16.mxu1 %vm1395_vm0, %v1394_v38 }
  0x2a   : > { %1259 = vmatprep.subr.bf16.mxu1 %v1394_v38 }
  0x2b   : > { %1220 = vmatpush3.bf16.msra.mxu0 %v1350_v41 }
  0x2c   : > { %1221 = vmatprep.subr.bf16.mxu0 %v1352_v43 }
  0x2d   : > { %1260 = vmatpush3.bf16.msra.mxu1 %v1351_v42  ;;  %v1153_v42 = vld [vmem:[%s1680_s4] ss:$0 sm:$0xff] }
  0x2e   : > { %1261 = vmatprep.subr.bf16.mxu1 %v1394_v38 }
  0x2f   : > { %1222 = vmatpush3.bf16.msra.mxu0 %v1353_v44 }
  0x30   : > { %1223 = vmatprep.subr.bf16.mxu0 %v1355_v46 }
  0x31   : > { %1262 = vmatpush3.bf16.msra.mxu1 %v1354_v45 }
  0x32   : > { %1263 = vmatprep.subr.bf16.mxu1 %v1394_v38 }
  0x33   : > { %1224 = vmatpush3.bf16.msra.mxu0 %v1356_v47 }
  0x34   : > { %1225 = vmatprep.subr.bf16.mxu0 %v1358_v49 }
  0x35   : > { %1264 = vmatpush3.bf16.msra.mxu1 %v1357_v48 }
  0x36   : > { %1265 = vmatprep.subr.bf16.mxu1 %v1394_v38 }
  0x37   : > { %1226 = vmatpush3.bf16.msra.mxu0 %v1359_v50 }
  0x38   : > { %1227 = vmatprep.subr.bf16.mxu0 %v1361_v52 }
  0x39   : > { %1266 = vmatpush3.bf16.msra.mxu1 %v1360_v51 }
  0x3a   : > { %1267 = vmatprep.subr.bf16.mxu1 %v1394_v38 }
  0x3b   : > { %1228 = vmatpush3.bf16.msra.mxu0 %v1362_v53 }
  0x3c   : > { %1229 = vmatprep.subr.bf16.mxu0 %v1364_v55 }
  0x3d   : > { %1268 = vmatpush3.bf16.msra.mxu1 %v1363_v54 }
  0x3e   : > { %1269 = vmatprep.subr.bf16.mxu1 %v1394_v38 }
  0x3f   : > { %1230 = vmatpush3.bf16.msra.mxu0 %v1365_v56 }
  0x40   : > { %1231 = vmatprep.subr.bf16.mxu0 %v1367_v59 }
  0x41   : > { %1270 = vmatpush3.bf16.msra.mxu1 %v1366_v57 }
  0x42   : > { %1271 = vmatprep.subr.bf16.mxu1 %v1394_v38 }
  0x43   : > { %1232 = vmatpush3.bf16.msra.mxu0 %v1368_v60 }
  0x44   : > { %1277 = vmatprep.subr.bf16.mxu0 %v1394_v38 }
  0x45   : > { %1272 = vmatpush3.bf16.msra.mxu1 %v1372_v61 }
  0x46   : > { %846 = vmatmul.mubr.bf16.vlgmr.msra.gmra.mrb[4].mxu0 %v1369_v62 }
  0x47   : > { %1293 = vmatprep.mubr.msk.bf16.mxu0 %vm1395_vm0, %v1394_v38  ;;  %1278 = vmatpush3.bf16.msra.mxu0 %v1374_v0 }
  0x48   : > { %1274 = vmatmul.mubr.bf16.vlgmr.msra.gmra.mrb[4].mxu1 %v1373_v63  ;;  %1279 = vmatprep.subr.bf16.mxu0 %v1394_v38 }
  0x4b   : > { %1280 = vmatpush3.bf16.msra.mxu0 %v1375_v1 }
  0x4c   : > { %1281 = vmatprep.subr.bf16.mxu0 %v1394_v38 }
  0x4f   : > { %1282 = vmatpush3.bf16.msra.mxu0 %v1376_v2 }
  0x50   : > { %1283 = vmatprep.subr.bf16.mxu0 %v1394_v38 }
  0x53   : > { %1284 = vmatpush3.bf16.msra.mxu0 %v1377_v3 }
  0x54   : > { %1285 = vmatprep.subr.bf16.mxu0 %v1394_v38 }
  0x57   : > { %1286 = vmatpush3.bf16.msra.mxu0 %v1378_v4 }
  0x58   : > { %1287 = vmatprep.subr.bf16.mxu0 %v1394_v38 }
  0x5b   : > { %1288 = vmatpush3.bf16.msra.mxu0 %v1379_v5 }
  0x5c   : > { %1289 = vmatprep.subr.bf16.mxu0 %v1394_v38 }
  0x5f   : > { %1290 = vmatpush3.bf16.msra.mxu0 %v1380_v6 }
  0x60   : > { %1291 = vmatprep.subr.bf16.mxu0 %v1394_v38 }
  0x63   : > { %1292 = vmatpush3.bf16.msra.mxu0 %v1381_v7 }
  0xf9   : > { %v1189_v8 = vpop.f32.mrb[0].mxu0 }
  0xfa   : > { %v1190_v10 = vpop.f32.mrb[1].mxu0 }
  0xfb   : > { %v1191_v11 = vadd.f32 %v1190_v10, %v1189_v8  ;;  %v1192_v12 = vpop.f32.mrb[2].mxu0  ;;  %v1211_v13 = vpop.f32.mrb[0].mxu1 }
  0xfc   : > { %v1193_v14 = vpop.f32.mrb[3].mxu0  ;;  %v1212_v17 = vpop.f32.mrb[1].mxu1 }
  0xfd   : > { %v766_v15 = vadd.f32 %v1191_v11, %v1089_v9  ;;  %v1194_v16 = vadd.f32 %v1193_v14, %v1192_v12  ;;  %v1213_v18 = vadd.f32 %v1212_v17, %v1211_v13  ;;  %v1214_v19 = vpop.f32.mrb[2].mxu1 }
  0xfe   : > { %v1215_v21 = vpop.f32.mrb[3].mxu1 }
  0xff   : > { %v769_v20 = vadd.f32 %v1194_v16, %v1089_v9  ;;  %v807_v22 = vadd.f32 %v1213_v18, %v766_v15  ;;  %v1216_v23 = vadd.f32 %v1215_v21, %v1214_v19 }
 0x101   : > { %v810_v24 = vadd.f32 %v1216_v23, %v769_v20 }
 0x119   : > { %v1233_v25 = vpop.f32.mrb[4].mxu0 }
 0x11a   : > { %v1234_v26 = vpop.f32.mrb[5].mxu0 }
 0x11b   : > { %v888_v27 = vpop.f32.mrb[4].mxu1  ;;  %v1235_v28 = vadd.f32 %v1234_v26, %v1233_v25  ;;  %v1236_v29 = vpop.f32.mrb[6].mxu0 }
 0x11c   : > { %v1275_v30 = vpop.f32.mrb[5].mxu1  ;;  %v1237_v31 = vpop.f32.mrb[7].mxu0 }
 0x11d   : > { %v891_v32 = vpop.f32.mrb[6].mxu1  ;;  %v848_v33 = vadd.f32 %v1235_v28, %v807_v22  ;;  %v1238_v34 = vadd.f32 %v1237_v31, %v1236_v29 }
 0x11e   : > { %v1276_v35 = vpop.f32.mrb[7].mxu1 }
 0x11f   : > { %v889_v36 = vadd.f32 %v888_v27, %v848_v33  ;;  %v851_v37 = vadd.f32 %v1238_v34, %v810_v24 }
 0x121   : > { %v892_v38 = vadd.f32 %v891_v32, %v851_v37  ;;  %v895_v39 = vmul.f32 %v889_v36, %v889_v36 }
 0x123   : > { %v896_v40 = vmul.f32 %v892_v38, %v892_v38 }
 0x125   : > { %v897_v41 = vpack.c.bf16 %v896_v40, %v895_v39 }
 0x127   : > { %1294 = vmatmul.mubr.bf16.vlgmr.msra.gmra.mrb[8].mxu0 %v897_v41 }
 0x1fa   : > { %v1003_v43 = vpop.f32.mrb[8].mxu0 }
 0x1fb   : > { %v1004_v44 = vadd.f32 %v1153_v42, %v1003_v43  ;;  %v1295_v45 = vpop.f32.mrb[9].mxu0 }
 0x1fc   : > { %v1006_v46 = vpop.f32.mrb[10].mxu0 }
 0x1fd   : > { %1382 = vrsqrt.f32 %v1004_v44  ;;  %v1007_v47 = vadd.f32 %v1153_v42, %v1006_v46  ;;  %v1296_v48 = vpop.f32.mrb[11].mxu0 }
 0x1ff   : > { %1384 = vrsqrt.f32 %v1007_v47 }
 0x207   : > { %v1383_v49 = vpop.eup %1382 }
 0x208   : > { %v1012_v51 = vmul.f32 %v1383_v49, %v889_v36 }
 0x209   : > { %v1385_v50 = vpop.eup %1384 }
 0x20a   : > { %v1013_v52 = vmul.f32 %v1385_v50, %v892_v38 }
 0x20c   : > { %v1171_v53 = vpack.c.bf16 %v1013_v52, %v1012_v51 }
 0x20e   : > { %1172 = vst [vmem:[%s229_s23] sm:$0xff] %v1171_v53  }
 0x20f PF: > { %s15_s18 = sadd.s32 1, %s1392_s18  }
 0x210   : > { %p12_p4 = scmp.ge.s32.totalorder %s15_s18, 4  }
 0x212   :  { %14 = sbr.rel (!%p12_p4) target bundleno = 1 (0x1), region = 70 }

// kernel: _lambda_.5
= control target key start
LH: loop header
LB: loop body
LE: loop exit
PB: predicated region body
PF: predicated region fallthrough
CT: control target
= control target key end

     0   :  { %v1093_v42 = vmov 0.0   ;;  %vm1094_vm0 = vmmov 0   ;;  %s1368_s0 = inlined_call_operand.vmem [shape: bf16[8,896], index: 0, kind: input, shape index: {}]   ;;  %s1369_s1 = inlined_call_operand.vmem [shape: bf16[896,128], index: 1, kind: input, shape index: {}]   ;;  %s1370_s2 = inlined_call_operand.vmem [shape: f32[1,128], index: 2, kind: input, shape index: {}]   ;;  %s1371_s3 = inlined_call_operand.vmem [shape: bf16[128,128], index: 3, kind: input, shape index: {}]   ;;  %s1372_s4 = inlined_call_operand.vmem [shape: f32[1,128], index: 4, kind: input, shape index: {}]   ;;  %s1373_s5 = inlined_call_operand.hbm [shape: f32[8,128], index: 5, kind: output, shape index: {}]  }
   0x1   :  { %v996_v0 = vld [vmem:[%s1369_s1 + $0x40] sm:$0xff]   ;;  %v1000_v4 = vld [vmem:[%s1369_s1 + $0x48] sm:$0xff]   ;;  %v1004_v8 = vld [vmem:[%s1369_s1 + $0x50] sm:$0xff]  }
   0x2   :  { %v997_v1 = vld [vmem:[%s1369_s1] sm:$0xff]   ;;  %869 = vmatprep.subr.bf16.mxu0 %v996_v0  ;;  %v1001_v5 = vld [vmem:[%s1369_s1 + $0x8] sm:$0xff]   ;;  %v1005_v9 = vld [vmem:[%s1369_s1 + $0x10] sm:$0xff]  }
   0x3   :  { %v998_v2 = vld [vmem:[%s1369_s1 + $0xc0] sm:$0xff]   ;;  %870 = vmatpush3.bf16.msra.mxu0 %v997_v1  ;;  %v1002_v6 = vld [vmem:[%s1369_s1 + $0xc8] sm:$0xff]   ;;  %v1006_v10 = vld [vmem:[%s1369_s1 + $0xd0] sm:$0xff]  }
   0x4   :  { %v999_v3 = vld [vmem:[%s1369_s1 + $0x80] sm:$0xff]   ;;  %891 = vmatprep.subr.bf16.mxu1 %v998_v2  ;;  %871 = vmatprep.subr.bf16.mxu0 %v1000_v4  ;;  %v1003_v7 = vld [vmem:[%s1369_s1 + $0x88] sm:$0xff]   ;;  %v1007_v11 = vld [vmem:[%s1369_s1 + $0x90] sm:$0xff]  }
   0x5   :  { %892 = vmatpush3.bf16.msra.mxu1 %v999_v3  ;;  %v1008_v12 = vld [vmem:[%s1369_s1 + $0x58] sm:$0xff]   ;;  %v1012_v16 = vld [vmem:[%s1369_s1 + $0x60] sm:$0xff]   ;;  %v1016_v20 = vld [vmem:[%s1369_s1 + $0x68] sm:$0xff]  }
   0x6   :  { %893 = vmatprep.subr.bf16.mxu1 %v1002_v6  ;;  %v1009_v13 = vld [vmem:[%s1369_s1 + $0x18] sm:$0xff]   ;;  %v1013_v17 = vld [vmem:[%s1369_s1 + $0x20] sm:$0xff]   ;;  %v1017_v21 = vld [vmem:[%s1369_s1 + $0x28] sm:$0xff]  }
   0x7   :  { %872 = vmatpush3.bf16.msra.mxu0 %v1001_v5  ;;  %v1010_v14 = vld [vmem:[%s1369_s1 + $0xd8] sm:$0xff]   ;;  %v1014_v18 = vld [vmem:[%s1369_s1 + $0xe0] sm:$0xff]   ;;  %v1018_v22 = vld [vmem:[%s1369_s1 + $0xe8] sm:$0xff]  }
   0x8   :  { %873 = vmatprep.subr.bf16.mxu0 %v1004_v8  ;;  %v1011_v15 = vld [vmem:[%s1369_s1 + $0x98] sm:$0xff]   ;;  %v1015_v19 = vld [vmem:[%s1369_s1 + $0xa0] sm:$0xff]   ;;  %v1019_v23 = vld [vmem:[%s1369_s1 + $0xa8] sm:$0xff]  }
   0x9   :  { %894 = vmatpush3.bf16.msra.mxu1 %v1003_v7  ;;  %v1020_v24 = vld [vmem:[%s1369_s1 + $0x70] sm:$0xff]   ;;  %v1024_v28 = vld [vmem:[%s1369_s1 + $0x78] sm:$0xff]   ;;  %v22_v31 = vld [vmem:[%s1368_s0] sm:$0xff] }
   0xa   :  { %895 = vmatprep.subr.bf16.mxu1 %v1006_v10  ;;  %v1021_v25 = vld [vmem:[%s1369_s1 + $0x30] sm:$0xff]   ;;  %v1025_v29 = vld [vmem:[%s1369_s1 + $0x38] sm:$0xff]   ;;  %v797_v32 = vcombine.low %v22_v31, %v22_v31  ;;  %v798_v33 = vcombine.high %v22_v31, %v22_v31  ;;  %v1030_v35 = vld [vmem:[%s1369_s1 + $0x140] sm:$0xff]  }
   0xb   :  { %874 = vmatpush3.bf16.msra.mxu0 %v1005_v9  ;;  %v1022_v26 = vld [vmem:[%s1369_s1 + $0xf0] sm:$0xff]   ;;  %v1026_v30 = vld [vmem:[%s1369_s1 + $0xf8] sm:$0xff]   ;;  %v23_v36 = vld [vmem:[%s1368_s0 + $0x8] sm:$0xff] }
   0xc   :  { %875 = vmatprep.subr.bf16.mxu0 %v1008_v12  ;;  %v1023_v27 = vld [vmem:[%s1369_s1 + $0xb0] sm:$0xff]   ;;  %v1029_v34 = vld [vmem:[%s1369_s1 + $0xb8] sm:$0xff]   ;;  %538 = vmatprep.mubr.bf16.mxu0 %v798_v33  ;;  %v799_v37 = vcombine.low %v23_v36, %v23_v36  ;;  %v800_v38 = vcombine.high %v23_v36, %v23_v36  ;;  %v1033_v39 = vld [vmem:[%s1369_s1 + $0x100] sm:$0xff]  }
   0xd   :  { %896 = vmatpush3.bf16.msra.mxu1 %v1007_v11  ;;  %v1034_v40 = vld [vmem:[%s1369_s1 + $0x180] sm:$0xff]   ;;  %v1035_v41 = vld [vmem:[%s1369_s1 + $0x148] sm:$0xff]   ;;  %v1038_v45 = vld [vmem:[%s1369_s1 + $0x150] sm:$0xff]  }
   0xe   :  { %897 = vmatprep.subr.bf16.mxu1 %v1010_v14  ;;  %578 = vmatprep.mubr.bf16.mxu1 %v800_v38  ;;  %v1036_v43 = vld [vmem:[%s1369_s1 + $0x108] sm:$0xff]   ;;  %v1039_v46 = vld [vmem:[%s1369_s1 + $0x110] sm:$0xff]   ;;  %v1041_v48 = vld [vmem:[%s1369_s1 + $0x158] sm:$0xff]  }
   0xf   :  { %876 = vmatpush3.bf16.msra.mxu0 %v1009_v13  ;;  %v1037_v44 = vld [vmem:[%s1369_s1 + $0x188] sm:$0xff]   ;;  %v1040_v47 = vld [vmem:[%s1369_s1 + $0x190] sm:$0xff]   ;;  %v1042_v49 = vld [vmem:[%s1369_s1 + $0x118] sm:$0xff]  }
  0x10   :  { %877 = vmatprep.subr.bf16.mxu0 %v1012_v16  ;;  %v1044_v50 = vld [vmem:[%s1369_s1 + $0x160] sm:$0xff]   ;;  %v1043_v51 = vld [vmem:[%s1369_s1 + $0x198] sm:$0xff]   ;;  %v1047_v53 = vld [vmem:[%s1369_s1 + $0x168] sm:$0xff]  }
  0x11   :  { %898 = vmatpush3.bf16.msra.mxu1 %v1011_v15  ;;  %v1045_v52 = vld [vmem:[%s1369_s1 + $0x120] sm:$0xff]   ;;  %v1048_v55 = vld [vmem:[%s1369_s1 + $0x128] sm:$0xff]   ;;  %v1050_v56 = vld [vmem:[%s1369_s1 + $0x170] sm:$0xff]  }
  0x12   :  { %899 = vmatprep.subr.bf16.mxu1 %v1014_v18  ;;  %v1046_v54 = vld [vmem:[%s1369_s1 + $0x1a0] sm:$0xff]   ;;  %v1049_v57 = vld [vmem:[%s1369_s1 + $0x1a8] sm:$0xff]   ;;  %v1051_v58 = vld [vmem:[%s1369_s1 + $0x130] sm:$0xff]  }
  0x13   :  { %878 = vmatpush3.bf16.msra.mxu0 %v1013_v17  ;;  %v24_v59 = vld [vmem:[%s1368_s0 + $0x10] sm:$0xff]  ;;  %v1053_v62 = vld [vmem:[%s1369_s1 + $0x178] sm:$0xff]  }
  0x14   :  { %879 = vmatprep.subr.bf16.mxu0 %v1016_v20  ;;  %v1052_v60 = vld [vmem:[%s1369_s1 + $0x1b0] sm:$0xff]   ;;  %v802_v61 = vcombine.high %v24_v59, %v24_v59  ;;  %v1054_v63 = vld [vmem:[%s1369_s1 + $0x138] sm:$0xff]   ;;  %v801_v1 = vcombine.low %v24_v59, %v24_v59 }
  0x15   :  { %900 = vmatpush3.bf16.msra.mxu1 %v1015_v19  ;;  %v1057_v0 = vld [vmem:[%s1369_s1 + $0x1b8] sm:$0xff]  }
  0x16   :  { %901 = vmatprep.subr.bf16.mxu1 %v1018_v22 }
  0x17   :  { %880 = vmatpush3.bf16.msra.mxu0 %v1017_v21 }
  0x18   :  { %881 = vmatprep.subr.bf16.mxu0 %v1020_v24 }
  0x19   :  { %902 = vmatpush3.bf16.msra.mxu1 %v1019_v23 }
  0x1a   :  { %903 = vmatprep.subr.bf16.mxu1 %v1022_v26 }
  0x1b   :  { %882 = vmatpush3.bf16.msra.mxu0 %v1021_v25 }
  0x1c   :  { %883 = vmatprep.subr.bf16.mxu0 %v1024_v28 }
  0x1d   :  { %904 = vmatpush3.bf16.msra.mxu1 %v1023_v27 }
  0x1e   :  { %905 = vmatprep.subr.bf16.mxu1 %v1026_v30 }
  0x1f   :  { %884 = vmatpush3.bf16.msra.mxu0 %v1025_v29 }
  0x20   :  { %913 = vmatprep.subr.bf16.mxu0 %v1030_v35 }
  0x21   :  { %906 = vmatpush3.bf16.msra.mxu1 %v1029_v34 }
  0x22   :  { %539 = vmatmul.mubr.bf16.vlgmr.msra.gmra.mrb[0].mxu0 %v797_v32  ;;  %953 = vmatprep.subr.bf16.mxu1 %v1093_v42 }
  0x23   :  { %914 = vmatpush3.bf16.msra.mxu0 %v1033_v39  ;;  %618 = vmatprep.mubr.bf16.mxu0 %v802_v61 }
  0x24   :  { %579 = vmatmul.mubr.bf16.vlgmr.msra.gmra.mrb[0].mxu1 %v799_v37  ;;  %915 = vmatprep.subr.bf16.mxu0 %v1035_v41 }
  0x25   :  { %954 = vmatpush3.bf16.msra.mxu1 %v1034_v40  ;;  %969 = vmatprep.mubr.msk.bf16.mxu1 %vm1094_vm0, %v1093_v42 }
  0x26   :  { %955 = vmatprep.subr.bf16.mxu1 %v1093_v42 }
  0x27   :  { %916 = vmatpush3.bf16.msra.mxu0 %v1036_v43 }
  0x28   :  { %917 = vmatprep.subr.bf16.mxu0 %v1038_v45 }
  0x29   :  { %956 = vmatpush3.bf16.msra.mxu1 %v1037_v44 }
  0x2a   :  { %957 = vmatprep.subr.bf16.mxu1 %v1093_v42 }
  0x2b   :  { %918 = vmatpush3.bf16.msra.mxu0 %v1039_v46 }
  0x2c   :  { %919 = vmatprep.subr.bf16.mxu0 %v1041_v48 }
  0x2d   :  { %958 = vmatpush3.bf16.msra.mxu1 %v1040_v47 }
  0x2e   :  { %959 = vmatprep.subr.bf16.mxu1 %v1093_v42 }
  0x2f   :  { %920 = vmatpush3.bf16.msra.mxu0 %v1042_v49 }
  0x30   :  { %921 = vmatprep.subr.bf16.mxu0 %v1044_v50 }
  0x31   :  { %960 = vmatpush3.bf16.msra.mxu1 %v1043_v51 }
  0x32   :  { %961 = vmatprep.subr.bf16.mxu1 %v1093_v42 }
  0x33   :  { %922 = vmatpush3.bf16.msra.mxu0 %v1045_v52 }
  0x34   :  { %923 = vmatprep.subr.bf16.mxu0 %v1047_v53 }
  0x35   :  { %962 = vmatpush3.bf16.msra.mxu1 %v1046_v54 }
  0x36   :  { %963 = vmatprep.subr.bf16.mxu1 %v1093_v42 }
  0x37   :  { %924 = vmatpush3.bf16.msra.mxu0 %v1048_v55 }
  0x38   :  { %925 = vmatprep.subr.bf16.mxu0 %v1050_v56 }
  0x39   :  { %964 = vmatpush3.bf16.msra.mxu1 %v1049_v57 }
  0x3a   :  { %965 = vmatprep.subr.bf16.mxu1 %v1093_v42 }
  0x3b   :  { %926 = vmatpush3.bf16.msra.mxu0 %v1051_v58 }
  0x3c   :  { %927 = vmatprep.subr.bf16.mxu0 %v1053_v62 }
  0x3d   :  { %966 = vmatpush3.bf16.msra.mxu1 %v1052_v60 }
  0x3e   :  { %967 = vmatprep.subr.bf16.mxu1 %v1093_v42 }
  0x3f   :  { %10 = vsyncpa [#allocation3], 0  ;;  %928 = vmatpush3.bf16.msra.mxu0 %v1054_v63  ;;  %v1058_v2 = vld [vmem:[%s1368_s0 + $0x18] ss:$0 sps:$4 sm:$0xff]   ;;  %v1059_v3 = vld [vmem:[%s1371_s3] sm:$0xff]   ;;  %s1095_s29 = smov [#allocation2]  }
  0x40   :  { %973 = vmatprep.subr.bf16.mxu0 %v1093_v42  ;;  %v1060_v4 = vld [vmem:[%s1371_s3 + $0x8] sm:$0xff]   ;;  %v1061_v5 = vld [vmem:[%s1371_s3 + $0x10] sm:$0xff]   ;;  %v1062_v6 = vld [vmem:[%s1371_s3 + $0x18] sm:$0xff]   ;;  %s788_s30 = sshll.u32 %s1095_s29, 4  ;;  %s789_s30 = int_to_ptr.vmem [resolvable:$true] %s788_s30 }
  0x41   :  { %968 = vmatpush3.bf16.msra.mxu1 %v1057_v0  ;;  %v1063_v7 = vld [vmem:[%s1371_s3 + $0x20] sm:$0xff]   ;;  %v1064_v8 = vld [vmem:[%s1371_s3 + $0x28] sm:$0xff]   ;;  %v1065_v9 = vld [vmem:[%s1371_s3 + $0x30] sm:$0xff]   ;;  %s1069_s6 = scalar_lea.vmem %s789_s30, 128  ;;  %p1074_p1 = scmp.lt.s32.totalorder %s789_s30, %s789_s30 }
  0x42   :  { %619 = vmatmul.mubr.bf16.vlgmr.msra.gmra.mrb[4].mxu0 %v801_v1  ;;  %v1066_v10 = vld [vmem:[%s1371_s3 + $0x38] sm:$0xff]   ;;  %v796_v12 = vld [vmem:[%s1370_s2] ss:$0 sm:$0xff]  ;;  %p1070_p0 = scmp.ne.s32.totalorder %s789_s30, %s1069_s6  ;;  %p1075_p2 = scmp.lt.s32.totalorder %s1069_s6, %s1069_s6 }
  0x43   :  { %989 = vmatprep.mubr.msk.bf16.mxu0 %vm1094_vm0, %v1093_v42  ;;  %974 = vmatpush3.bf16.msra.mxu0 %v1059_v3  ;;  %v860_v37 = vld [vmem:[%s1372_s4] ss:$0 sm:$0xff] }
  0x44   :  { %970 = vmatmul.mubr.bf16.vlgmr.msra.gmra.mrb[4].mxu1 %v1058_v2  ;;  %975 = vmatprep.subr.bf16.mxu0 %v1093_v42  ;;  %p1076_p3 = por %p1075_p2, %p1074_p1 }
  0x46   :  { %p1077_p4 = pnand %p1076_p3, %p1070_p0 }
  0x47   :  { %976 = vmatpush3.bf16.msra.mxu0 %v1060_v4 }
  0x48   :  { %977 = vmatprep.subr.bf16.mxu0 %v1093_v42 }
  0x4b   :  { %978 = vmatpush3.bf16.msra.mxu0 %v1061_v5 }
  0x4c   :  { %979 = vmatprep.subr.bf16.mxu0 %v1093_v42 }
  0x4f   :  { %980 = vmatpush3.bf16.msra.mxu0 %v1062_v6 }
  0x50   :  { %981 = vmatprep.subr.bf16.mxu0 %v1093_v42 }
  0x53   :  { %982 = vmatpush3.bf16.msra.mxu0 %v1063_v7 }
  0x54   :  { %983 = vmatprep.subr.bf16.mxu0 %v1093_v42 }
  0x57   :  { %984 = vmatpush3.bf16.msra.mxu0 %v1064_v8 }
  0x58   :  { %985 = vmatprep.subr.bf16.mxu0 %v1093_v42 }
  0x5b   :  { %986 = vmatpush3.bf16.msra.mxu0 %v1065_v9 }
  0x5c   :  { %987 = vmatprep.subr.bf16.mxu0 %v1093_v42 }
  0x5f   :  { %988 = vmatpush3.bf16.msra.mxu0 %v1066_v10 }
  0xf5   :  { %v885_v11 = vpop.f32.mrb[0].mxu0 }
  0xf6   :  { %v886_v13 = vpop.f32.mrb[1].mxu0 }
  0xf7   :  { %v887_v14 = vadd.f32 %v886_v13, %v885_v11  ;;  %v888_v15 = vpop.f32.mrb[2].mxu0  ;;  %v907_v16 = vpop.f32.mrb[0].mxu1 }
  0xf8   :  { %v889_v17 = vpop.f32.mrb[3].mxu0  ;;  %v908_v18 = vpop.f32.mrb[1].mxu1 }
  0xf9   :  { %v541_v19 = vadd.f32 %v887_v14, %v796_v12  ;;  %v909_v20 = vadd.f32 %v908_v18, %v907_v16  ;;  %v910_v21 = vpop.f32.mrb[2].mxu1 }
  0xfa   :  { %v911_v22 = vpop.f32.mrb[3].mxu1 }
  0xfb   :  { %v581_v23 = vadd.f32 %v909_v20, %v541_v19 }
 0x115   :  { %v929_v24 = vpop.f32.mrb[4].mxu0 }
 0x116   :  { %v930_v25 = vpop.f32.mrb[5].mxu0 }
 0x117   :  { %v931_v26 = vadd.f32 %v930_v25, %v929_v24  ;;  %v932_v27 = vpop.f32.mrb[6].mxu0  ;;  %v660_v28 = vpop.f32.mrb[4].mxu1 }
 0x118   :  { %v933_v29 = vpop.f32.mrb[7].mxu0  ;;  %v971_v30 = vpop.f32.mrb[5].mxu1 }
 0x119   :  { %v621_v31 = vadd.f32 %v931_v26, %v581_v23  ;;  %v663_v32 = vpop.f32.mrb[6].mxu1 }
 0x11a   :  { %v972_v33 = vpop.f32.mrb[7].mxu1 }
 0x11b   :  { %v661_v34 = vadd.f32 %v660_v28, %v621_v31 }
 0x11d   :  { %v666_v35 = vmul.f32 %v661_v34, %v661_v34 }
 0x11f   :  { %v667_v36 = vpack.c.bf16 %v666_v35, %v666_v35 }
 0x121   :  { %990 = vmatmul.mubr.bf16.vlgmr.msra.gmra.mrb[8].mxu0 %v667_v36 }
 0x1f4   :  { %v773_v38 = vpop.f32.mrb[8].mxu0 }
 0x1f5   :  { %v774_v39 = vadd.f32 %v860_v37, %v773_v38  ;;  %v991_v40 = vpop.f32.mrb[9].mxu0 }
 0x1f6   :  { %v776_v41 = vpop.f32.mrb[10].mxu0 }
 0x1f7   :  { %1067 = vrsqrt.f32 %v774_v39  ;;  %v992_v42 = vpop.f32.mrb[11].mxu0 }
 0x201   :  { %v1068_v43 = vpop.eup %1067 }
 0x202   :  { %v780_v44 = vmul.f32 %v1068_v43, %v661_v34 }
 0x204   :  { %781 = vst [vmem:[#allocation2] sm:$0xff] %v780_v44 }
 0x205   :  { %1080 = shalt.err (!%p1077_p4)
}
 0x206   :  { %s1081_s8 = scalar_lea.hbm %s1373_s5, 128 }
 0x207   :  { %p1082_p5 = scmp.ne.s32.totalorder %s1373_s5, %s1081_s8  ;;  %p1085_p6 = scmp.lt.u32.totalorder %s1081_s8, %s1373_s5 }
 0x209   :  { %p1087_p7 = pnand %p1085_p6, %p1082_p5 }
 0x20b   :  { %1090 = shalt.err (!%p1087_p7)
}
 0x20c   :  { %791 = dma.vmem_to_hbm [thread:$0]  %s789_s30, 128, %s1373_s5, [#allocation3]  }
 0x20d   :  { %1091 = dma.done.wait [#allocation3], 128  }
 0x20e   :  { %1092 = vsyncadd [#allocation3], 4294967168 }
 0x20f   :  { %795 = vsyncpa [#allocation3], 1 }

</bundles_post_ra>
